<compile_context>
chip_gen: v7x
topology: tpu7x:2x2x1
jax: 0.10.0
libtpu: 0.0.40
codegen_flags: <defaults>
</compile_context>

<pallas_src>
import functools

import jax
import jax.numpy as jnp
from jax.experimental import pallas as pl
from jax.experimental.pallas import tpu as pltpu

ALPHA = 0.75
GAMMA = 2.0

_VMEM_LIMIT_BYTES = 32 * 1024 * 1024   # explicit; safe on v5e/v6e (128 MiB) and v7x (64 MiB)
_TARGET_TILE_BYTES = 2 * 1024 * 1024   # per operand per pipeline buffer (f32) -> <8 MiB working set


def _pow(x, gamma):
    """x ** gamma with gamma a static Python float (x >= 0)."""
    g = float(gamma)
    if g == float(int(g)) and int(g) >= 0:
        w = jnp.ones_like(x)
        for _ in range(int(g)):
            w = w * x
        return w
    # generic path: clamp to avoid log(0)
    return jnp.exp(g * jnp.log(jnp.maximum(x, 1e-30)))


def _focal_elementwise(x, t, alpha, gamma):
    """Per-element focal loss (f32 in/out); softmax over the last (lane) axis."""
    # softmax(inputs, dim=1), max-subtracted for stability
    m = jnp.max(x, axis=-1, keepdims=True)
    e = jnp.exp(x - m)
    row_sum = jnp.sum(e, axis=-1, keepdims=True)
    inv = pl.reciprocal(row_sum, approx=True)     # EUP slot instead of full-width divide
    inv = inv * (2.0 - row_sum * inv)             # one Newton step -> full f32 accuracy
    p = e * inv

    # binary_cross_entropy_with_logits, stable elementwise form
    ce = jnp.maximum(x, 0.0) - x * t + jnp.log1p(jnp.exp(-jnp.abs(x)))

    # 1 - p_t = 1 - (p*t + (1-p)*(1-t)) = p + t - 2*p*t
    one_minus_pt = p + t - 2.0 * p * t
    # alpha_t = alpha*t + (1-alpha)*(1-t) = (1-alpha) + (2*alpha-1)*t
    alpha_t = (1.0 - alpha) + (2.0 * alpha - 1.0) * t
    return alpha_t * ce * _pow(one_minus_pt, gamma)


def _focal_sum_kernel(x_ref, t_ref, psum_ref, *, alpha, gamma, n_rows, tile_n):
    i = pl.program_id(0)
    x = x_ref[...].astype(jnp.float32)
    t = t_ref[...].astype(jnp.float32)
    f = _focal_elementwise(x, t, alpha, gamma)

    # Mask rows of the (possibly padded) last tile: OOB block contents are
    # unspecified and must not leak into the reduction.
    row_ids = jax.lax.broadcasted_iota(jnp.int32, f.shape, 0) + i * tile_n
    f = jnp.where(row_ids < n_rows, f, 0.0)

    # One f32 partial sum per tile, written lane-dense (unmasked vst).
    psum_ref[...] = jnp.full(psum_ref.shape, jnp.sum(f), dtype=psum_ref.dtype)


def _focal_map_kernel(x_ref, t_ref, o_ref, *, alpha, gamma):
    x = x_ref[...].astype(jnp.float32)
    t = t_ref[...].astype(jnp.float32)
    o_ref[...] = _focal_elementwise(x, t, alpha, gamma).astype(o_ref.dtype)


def _choose_tile_n(n, c):
    rows = _TARGET_TILE_BYTES // max(c * 4, 1)
    rows = min(max(rows, 8), 1024)   # large enough to amortize per-step overhead
    if rows >= n:
        return n                     # single full block: no divisibility constraint
    return max(8, (rows // 8) * 8)   # sublane-aligned tile


def focal_loss_multi_fb(inputs, targets, alpha=ALPHA, gamma=GAMMA, reduce=True,
                        tile_n=None):
    """Pallas TPU implementation of FocalLossMultiFB.forward."""
    assert inputs.shape == targets.shape and inputs.ndim == 2
    n, c = inputs.shape

    if tile_n is None:
        tile_n = _choose_tile_n(n, c)
    tile_n = min(int(tile_n), n)
    if tile_n < n:
        assert tile_n % 8 == 0, "tile_n must be a multiple of 8 when tiling N"
    num_tiles = pl.cdiv(n, tile_n)

    in_specs = [
        pl.BlockSpec((tile_n, c), lambda i: (i, 0)),
        pl.BlockSpec((tile_n, c), lambda i: (i, 0)),
    ]
    compiler_params = pltpu.CompilerParams(
        dimension_semantics=("parallel",),      # independent tiles: megacore-safe on v7x
        vmem_limit_bytes=_VMEM_LIMIT_BYTES,
    )
    in_bytes = (inputs.size * inputs.dtype.itemsize
                + targets.size * targets.dtype.itemsize)

    if reduce:
        kernel = functools.partial(
            _focal_sum_kernel, alpha=float(alpha), gamma=float(gamma),
            n_rows=n, tile_n=tile_n)
        cost = pl.CostEstimate(
            flops=15 * n * c,
            transcendentals=3 * n * c,
            bytes_accessed=in_bytes + num_tiles * 8 * 128 * 4)
        psums = pl.pallas_call(
            kernel,
            out_shape=jax.ShapeDtypeStruct((num_tiles, 8, 128), jnp.float32),
            grid=(num_tiles,),
            in_specs=in_specs,
            out_specs=pl.BlockSpec((1, 8, 128), lambda i: (i, 0, 0)),
            compiler_params=compiler_params,
            cost_estimate=cost,
        )(inputs, targets)
        # Tiny cross-tile finish: sum per-tile partials, divide by N*C exactly once.
        return jnp.sum(psums[:, 0, 0]) / (n * c)

    # reduce=False: return the per-element focal loss map.
    kernel = functools.partial(
        _focal_map_kernel, alpha=float(alpha), gamma=float(gamma))
    cost = pl.CostEstimate(
        flops=15 * n * c,
        transcendentals=3 * n * c,
        bytes_accessed=in_bytes + n * c * 4)
    return pl.pallas_call(
        kernel,
        out_shape=jax.ShapeDtypeStruct((n, c), jnp.float32),
        grid=(num_tiles,),
        in_specs=in_specs,
        out_specs=pl.BlockSpec((tile_n, c), lambda i: (i, 0)),
        compiler_params=compiler_params,
        cost_estimate=cost,
    )(inputs, targets)


def _reference_map(inputs, targets, alpha=ALPHA, gamma=GAMMA):
    x = inputs.astype(jnp.float32)
    t = targets.astype(jnp.float32)
    p = jax.nn.softmax(x, axis=1)
    ce = jnp.maximum(x, 0.0) - x * t + jnp.log1p(jnp.exp(-jnp.abs(x)))
    p_t = p * t + (1.0 - p) * (1.0 - t)
    f_loss = ce * (1.0 - p_t) ** gamma
    alpha_t = alpha * t + (1.0 - alpha) * (1.0 - t)
    return alpha_t * f_loss


if __name__ == "__main__":
    key = jax.random.PRNGKey(0)
    k1, k2, k3, k4 = jax.random.split(key, 4)

    # Case 1: ragged shape (N not a multiple of the tile, C not a multiple of
    # 128) with explicit tiling so the multi-tile partial-sum path and the
    # padded-row masking are exercised. Binary targets travel as bf16 (exact
    # for 0/1) to cut HBM traffic.
    N1, C1 = 20, 24
    x1 = jax.random.normal(k1, (N1, C1), dtype=jnp.float32)
    t1 = jax.random.bernoulli(k2, p=0.3, shape=(N1, C1)).astype(jnp.bfloat16)

    loss1 = jax.block_until_ready(focal_loss_multi_fb(x1, t1, reduce=True, tile_n=8))
    ref1 = jax.block_until_ready(jnp.mean(_reference_map(x1, t1)))
    assert jnp.allclose(loss1, ref1, rtol=1e-5, atol=1e-7), (loss1, ref1)

    fmap = jax.block_until_ready(focal_loss_multi_fb(x1, t1, reduce=False, tile_n=8))
    refm = jax.block_until_ready(_reference_map(x1, t1))
    assert fmap.shape == refm.shape, (fmap.shape, refm.shape)
    assert jnp.allclose(fmap, refm, rtol=1e-4, atol=1e-6)

    # Case 2: lane-aligned shape with the auto-chosen (single) tile.
    N2, C2 = 8, 128
    x2 = jax.random.normal(k3, (N2, C2), dtype=jnp.float32)
    t2 = jax.random.bernoulli(k4, p=0.3, shape=(N2, C2)).astype(jnp.bfloat16)
    loss2 = jax.block_until_ready(focal_loss_multi_fb(x2, t2, reduce=True))
    ref2 = jax.block_until_ready(jnp.mean(_reference_map(x2, t2)))
    assert jnp.allclose(loss2, ref2, rtol=1e-5, atol=1e-7), (loss2, ref2)

    print("KERNEL_OK")
</pallas_src>

<mosaic_0001>
module attributes {stable_mosaic.version = 11 : i64} {
  func.func @_focal_sum_kernel(%arg0: i32, %arg1: memref<8x24xf32, #tpu.memory_space<vmem>>, %arg2: memref<8x24xbf16, #tpu.memory_space<vmem>>, %arg3: memref<1x8x128xf32, #tpu.memory_space<vmem>>) attributes {dimension_semantics = [#tpu.dimension_semantics<parallel>], iteration_bounds = array<i64: 3>, scalar_prefetch = 0 : i64, scratch_operands = 0 : i64, tpu.core_type = #tpu.core_type<tc>, window_params = [{transform_indices = @transform_0, window_bounds = array<i64: 8, 24>}, {transform_indices = @transform_1, window_bounds = array<i64: 8, 24>}, {transform_indices = @transform_2, window_bounds = array<i64: 1, 8, 128>}]} {
    %c0 = arith.constant 0 : index
    %c0_0 = arith.constant 0 : index
    %0 = vector.load %arg1[%c0, %c0_0] : memref<8x24xf32, #tpu.memory_space<vmem>>, vector<8x24xf32>
    %c0_1 = arith.constant 0 : index
    %c0_2 = arith.constant 0 : index
    %1 = vector.load %arg2[%c0_1, %c0_2] : memref<8x24xbf16, #tpu.memory_space<vmem>>, vector<8x24xbf16>
    %2 = arith.extf %1 : vector<8x24xbf16> to vector<8x24xf32>
    %cst = arith.constant dense<0xFF800000> : vector<8xf32>
    %3 = vector.multi_reduction <maximumf>, %0, %cst [1] : vector<8x24xf32> to vector<8xf32>
    %4 = vector.shape_cast %3 : vector<8xf32> to vector<8x1xf32>
    %5 = vector.broadcast %4 : vector<8x1xf32> to vector<8x24xf32>
    %6 = arith.subf %0, %5 : vector<8x24xf32>
    %7 = math.exp %6 : vector<8x24xf32>
    %cst_3 = arith.constant dense<0.000000e+00> : vector<8xf32>
    %8 = vector.multi_reduction <add>, %7, %cst_3 [1] : vector<8x24xf32> to vector<8xf32>
    %9 = vector.shape_cast %8 : vector<8xf32> to vector<8x1xf32>
    %10 = tpu.reciprocal %9 {approx = true} : vector<8x1xf32> -> vector<8x1xf32>
    %11 = arith.mulf %9, %10 : vector<8x1xf32>
    %cst_4 = arith.constant 2.000000e+00 : f32
    %12 = vector.broadcast %cst_4 : f32 to vector<8x1xf32>
    %13 = arith.subf %12, %11 : vector<8x1xf32>
    %14 = arith.mulf %10, %13 : vector<8x1xf32>
    %15 = vector.broadcast %14 : vector<8x1xf32> to vector<8x24xf32>
    %16 = arith.mulf %7, %15 : vector<8x24xf32>
    %cst_5 = arith.constant 0.000000e+00 : f32
    %17 = vector.broadcast %cst_5 : f32 to vector<8x24xf32>
    %18 = arith.maximumf %0, %17 : vector<8x24xf32>
    %19 = arith.mulf %0, %2 : vector<8x24xf32>
    %20 = arith.subf %18, %19 : vector<8x24xf32>
    %21 = math.absf %0 : vector<8x24xf32>
    %cst_6 = arith.constant 0.000000e+00 : f32
    %22 = vector.broadcast %cst_6 : f32 to vector<8x24xf32>
    %23 = arith.subf %22, %21 : vector<8x24xf32>
    %24 = math.exp %23 : vector<8x24xf32>
    %25 = math.log1p %24 : vector<8x24xf32>
    %26 = arith.addf %20, %25 : vector<8x24xf32>
    %27 = arith.addf %16, %2 : vector<8x24xf32>
    %cst_7 = arith.constant 2.000000e+00 : f32
    %28 = vector.broadcast %cst_7 : f32 to vector<8x24xf32>
    %29 = arith.mulf %28, %16 : vector<8x24xf32>
    %30 = arith.mulf %29, %2 : vector<8x24xf32>
    %31 = arith.subf %27, %30 : vector<8x24xf32>
    %cst_8 = arith.constant 5.000000e-01 : f32
    %32 = vector.broadcast %cst_8 : f32 to vector<8x24xf32>
    %33 = arith.mulf %32, %2 : vector<8x24xf32>
    %cst_9 = arith.constant 2.500000e-01 : f32
    %34 = vector.broadcast %cst_9 : f32 to vector<8x24xf32>
    %35 = arith.addf %34, %33 : vector<8x24xf32>
    %36 = arith.mulf %35, %26 : vector<8x24xf32>
    %cst_10 = arith.constant 1.000000e+00 : f32
    %37 = vector.broadcast %cst_10 : f32 to vector<8x24xf32>
    %38 = arith.mulf %37, %31 : vector<8x24xf32>
    %39 = arith.mulf %38, %31 : vector<8x24xf32>
    %40 = arith.mulf %36, %39 : vector<8x24xf32>
    %41 = tpu.iota {dimensions = array<i32: 0>} : vector<8x24xi32>
    %c8_i32 = arith.constant 8 : i32
    %42 = arith.muli %arg0, %c8_i32 : i32
    %43 = vector.broadcast %42 : i32 to vector<8x24xi32>
    %44 = arith.addi %41, %43 : vector<8x24xi32>
    %c20_i32 = arith.constant 20 : i32
    %45 = vector.broadcast %c20_i32 : i32 to vector<8x24xi32>
    %46 = arith.cmpi slt, %44, %45 : vector<8x24xi32>
    %cst_11 = arith.constant 0.000000e+00 : f32
    %47 = vector.broadcast %cst_11 : f32 to vector<8x24xf32>
    %48 = arith.select %46, %40, %47 : vector<8x24xi1>, vector<8x24xf32>
    %49 = vector.shape_cast %48 : vector<8x24xf32> to vector<1x8x24xf32>
    %cst_12 = arith.constant dense<0.000000e+00> : vector<1xf32>
    %50 = vector.multi_reduction <add>, %49, %cst_12 [1, 2] : vector<1x8x24xf32> to vector<1xf32>
    %51 = vector.shape_cast %50 : vector<1xf32> to vector<1x1x1xf32>
    %52 = vector.extract %51[0, 0, 0] : f32 from vector<1x1x1xf32>
    %53 = vector.broadcast %52 : f32 to vector<1x8x128xf32>
    %c0_13 = arith.constant 0 : index
    %c0_14 = arith.constant 0 : index
    %c0_15 = arith.constant 0 : index
    %54 = vector.load %arg3[%c0_13, %c0_14, %c0_15] : memref<1x8x128xf32, #tpu.memory_space<vmem>>, vector<1x8x128xf32>
    tpu.vector_store %arg3[%c0_13, %c0_14, %c0_15], %53 {strides = array<i32>} : memref<1x8x128xf32, #tpu.memory_space<vmem>>, vector<1x8x128xf32>,
    return
  }
  func.func @transform_0(%arg0: i32) -> (i32, i32) {
    %c0_i32 = arith.constant 0 : i32
    %c0_i32_0 = arith.constant 0 : i32
    return %arg0, %c0_i32 : i32, i32
  }
  func.func @transform_1(%arg0: i32) -> (i32, i32) {
    %c0_i32 = arith.constant 0 : i32
    %c0_i32_0 = arith.constant 0 : i32
    return %arg0, %c0_i32 : i32, i32
  }
  func.func @transform_2(%arg0: i32) -> (i32, i32, i32) {
    %c0_i32 = arith.constant 0 : i32
    %c0_i32_0 = arith.constant 0 : i32
    %c0_i32_1 = arith.constant 0 : i32
    return %arg0, %c0_i32, %c0_i32_0 : i32, i32, i32
  }
}

</mosaic_0001>

<bundles_post_ra>
// kernel: tpu_custom_call.1
= control target key start
LH: loop header
LB: loop body
LE: loop exit
PB: predicated region body
PF: predicated region fallthrough
CT: control target
= control target key end

     0   :  { %7 = vsyncpa [#allocation3], 0  ;;  %s803_s0 = inlined_call_operand.hbm [shape: f32[20,24], index: 0, kind: input, shape index: {}]   ;;  %s804_s1 = inlined_call_operand.hbm [shape: bf16[20,24], index: 1, kind: input, shape index: {}]   ;;  %s805_s2 = inlined_call_operand.hbm [shape: f32[3,8,128], index: 2, kind: output, shape index: {}]  }
   0x1   :  { %9 = vsyncpa [#allocation3 + $0x1], 0 }
   0x2   :  { %10 = vsyncpa [#allocation6], 0 }
   0x3   :  { %12 = vsyncpa [#allocation6 + $0x1], 0 }
   0x4   :  { %13 = vsyncpa [#allocation4], 0 }
   0x5   :  { %15 = vsyncpa [#allocation4 + $0x1], 0  ;;  %s593_s9 = smov 0   ;;  %s595_s10 = smov 0  }
   0x6   :  { %s597_s11 = smov 0   ;;  %s599_s12 = smov 0  }
   0x7 LB: > { %s614_s13 = sadd.s32 4294967295, %s573_s12   ;;  %s366_s14 = sadd.s32 4294967294, %s573_s12   ;;  %s573_s12 = sphi %s599_s12, %s823_s12   ;;  %s569_s11 = sphi %s597_s11, %s822_s11   ;;  %s565_s10 = sphi %s595_s10, %s821_s10   ;;  %s561_s9 = sphi %s593_s9, %s820_s9  }
   0x8   : > { %s618_s15 = sadd.s32 1, %s573_s12   ;;  %s28_s16 = sadd.s32 1, %s569_s11 }
   0x9   : > { %s25_s17 = ssub.s32 %s573_s12, %s618_s15  ;;  %p35_p0 = scmp.ne.s32.totalorder %s569_s11, %s565_s10 }
   0xa   : > { %p26_p1 = scmp.eq.s32.totalorder %s25_s17, 0  ;;  %p36_p2 = scmp.eq.s32.totalorder %s573_s12, 0 }
   0xb   : > { %p41_p3 = scmp.ne.s32.totalorder %s565_s10, %s561_s9  ;;  %p42_p4 = scmp.eq.s32.totalorder %s614_s13, 0 }
   0xc   : > { %s630_s18 = scalar_select %p26_p1, %s569_s11, %s28_s16  }
   0xd   : > { %p632_p5 = por %p36_p2, %p35_p0  ;;  %p636_p6 = por %p42_p4, %p41_p3 }
   0xe   : > { %p91_p7 = scmp.eq.s32.totalorder %s614_s13, 2  ;;  %p97_p8 = scmp.eq.s32.totalorder %s366_s14, 2 }
   0xf   : > { %s809_s20 = scalar_select %p636_p6, 1, 0 }
  0x10   : > { %p401_p9 = scmp.lt.s32.totalorder %s573_s12, 3  ;;  %p642_p10 = por %p91_p7, %p35_p0 }
  0x11   : > { %p646_p11 = por %p97_p8, %p41_p3  ;;  %s651_s23 = sand.u32 1, %s569_s11  }
  0x12   : > { %s810_s21 = scalar_select %p642_p10, 1, 0 }
  0x13   : > { %s811_s22 = scalar_select %p646_p11, 1, 0 }
  0x14   : > { %s370_s24 = sshll.u32 %s573_s12, 7  ;;  %s369_s25 = sshll.u32 %s651_s23, 3 }
  0x15   : > { %s658_s28 = scalar_lea.hbm %s803_s0, %s370_s24  ;;  %s121_s29 = scalar_lea.vmem [#allocation2], %s369_s25 }
  0x16   : > { %s128_s30 = sshll.u32 %s121_s29, 4  ;;  %p662_p12 = pnand %p401_p9, %p632_p5  ;;  %s666_s30 = int_to_ptr.vmem [resolvable:$true] %s128_s30 }
  0x17   : > { %s118_s4 = scalar_lea.sflag [#allocation3], %s651_s23  ;;  %s443_s5 = scalar_lea.hbm %s658_s28, 128 }
  0x18   : > { %p444_p1 = scmp.ne.s32.totalorder %s658_s28, %s443_s5  ;;  %p445_p2 = pneg %p662_p12 }
  0x19   : > { %s448_s8 = scalar_lea.hbm %s803_s0, 384  ;;  %p449_p5 = scmp.lt.u32.totalorder %s658_s28, %s803_s0 }
  0x1a   : > { %p446_p3 = pnand %p445_p2, %p444_p1  ;;  %p450_p7 = scmp.lt.u32.totalorder %s448_s8, %s443_s5 }
  0x1b   : > { %p452_p9 = scmp.lt.u32.totalorder %s443_s5, %s658_s28 }
  0x1c   : > { %p447_p4 = pneg %p446_p3  ;;  %p451_p8 = por %p450_p7, %p449_p5 }
  0x1e   : > { %p453_p13 = por %p452_p9, %p451_p8 }
  0x20   : > { %p454_p0 = pnand %p453_p13, %p447_p4 }
  0x22   : > { %457 = shalt.err (!%p454_p0)
}
  0x23   : > { %s458_s17 = scalar_lea.vmem %s666_s30, 128  ;;  %s575_s19 = smov [#allocation2]  }
  0x24   : > { %p459_p1 = scmp.ne.s32.totalorder %s666_s30, %s458_s17  ;;  %s463_s24 = sshll.u32 %s575_s19, 4  ;;  %s464_s24 = int_to_ptr.vmem [resolvable:$false] %s463_s24 }
  0x25   : > { %s465_s25 = scalar_lea.vmem %s464_s24, 256  ;;  %p466_p10 = scmp.lt.s32.totalorder %s666_s30, %s464_s24 }
  0x26   : > { %p461_p3 = pnand %p459_p1, %p445_p2  ;;  %p467_p5 = scmp.lt.s32.totalorder %s465_s25, %s458_s17 }
  0x28   : > { %p462_p11 = pneg %p461_p3  ;;  %p468_p7 = por %p467_p5, %p466_p10 }
  0x2a   : > { %p469_p8 = pnand %p468_p7, %p462_p11 }
  0x2c   : > { %472 = shalt.err (!%p469_p8)
}
  0x2d   : > { %393 = dma.hbm_to_vmem [thread:$0]  (!%p662_p12), %s658_s28, 128, %s666_s30, %s118_s4  }
  0x2e   : > { %p813_p13 = scmp.lt.s32.totalorder %s573_s12, 4  ;;  %p814_p0 = scmp.ge.s32.totalorder %s573_s12, 1 }
  0x2f   : > { %s371_s27 = sshll.u32 %s651_s23, 2  ;;  %s372_s29 = sshll.u32 %s573_s12, 6 }
  0x30   : > { %p700_p4 = pnand %p814_p0, %p813_p13  ;;  %s709_s7 = scalar_lea.hbm %s804_s1, %s372_s29 }
  0x31   : > { %s139_s8 = scalar_lea.vmem [#allocation5], %s371_s27  ;;  %s136_s28 = scalar_lea.sflag [#allocation6], %s651_s23 }
  0x32   : > { %s815_s26 = scalar_select %p700_p4, 1, 0 }
  0x33   : > { %s146_s14 = sshll.u32 %s139_s8, 4  ;;  %s473_s30 = scalar_lea.hbm %s709_s7, 64  ;;  %s147_s14 = int_to_ptr.vmem [resolvable:$true] %s146_s14 }
  0x34   : > { %p474_p10 = scmp.ne.s32.totalorder %s709_s7, %s473_s30  ;;  %s478_s17 = scalar_lea.hbm %s804_s1, 192 }
  0x35   : > { %p479_p1 = scmp.lt.u32.totalorder %s709_s7, %s804_s1  ;;  %p480_p3 = scmp.lt.u32.totalorder %s478_s17, %s473_s30 }
  0x36   : > { %p476_p11 = pnand %p474_p10, %p445_p2  ;;  %p482_p7 = scmp.lt.u32.totalorder %s473_s30, %s709_s7 }
  0x37   : > { %p481_p5 = por %p480_p3, %p479_p1 }
  0x38   : > { %p477_p9 = pneg %p476_p11 }
  0x39   : > { %p483_p8 = por %p482_p7, %p481_p5 }
  0x3b   : > { %p484_p13 = pnand %p483_p8, %p477_p9 }
  0x3d   : > { %487 = shalt.err (!%p484_p13)
}
  0x3e   : > { %s488_s23 = scalar_lea.vmem %s147_s14, 64  ;;  %s576_s25 = smov [#allocation5]  }
  0x3f   : > { %p489_p0 = scmp.ne.s32.totalorder %s147_s14, %s488_s23  ;;  %s493_s27 = sshll.u32 %s576_s25, 4  ;;  %s494_s27 = int_to_ptr.vmem [resolvable:$false] %s493_s27 }
  0x40   : > { %s495_s29 = scalar_lea.vmem %s494_s27, 128  ;;  %p496_p6 = scmp.lt.s32.totalorder %s147_s14, %s494_s27 }
  0x41   : > { %p491_p10 = pnand %p489_p0, %p445_p2  ;;  %p497_p4 = scmp.lt.s32.totalorder %s495_s29, %s488_s23 }
  0x43   : > { %p492_p11 = pneg %p491_p10  ;;  %p498_p1 = por %p497_p4, %p496_p6 }
  0x45   : > { %p499_p3 = pnand %p498_p1, %p492_p11 }
  0x47   : > { %502 = shalt.err (!%p499_p3)
}
  0x48   : > { %396 = dma.hbm_to_vmem [thread:$0]  (!%p662_p12), %s709_s7, 64, %s147_s14, %s136_s28  }
  0x49   : > { %p816_p9 = scmp.ne.s32.totalorder %s815_s26, 0 }
  0x4a   : > { %s734_s5 = sand.u32 (!%p816_p9), 1, %s565_s10   ;;  %p817_p6 = scmp.ne.s32.totalorder (!%p816_p9), %s809_s20, 0 }
  0x4b   : > { %155 = sbr.rel (%p816_p9) target bundleno = 638 (0x27e), region = 28  ;;  %s374_s6 = sshll.u32 (!%p816_p9), %s734_s5, 3 }
  0x4c   : > { %s158_s8 = scalar_lea.sflag (!%p816_p9), [#allocation3], %s734_s5  ;;  %s161_s30 = scalar_lea.vmem (!%p816_p9), [#allocation2], %s374_s6 }
  0x52   : > { %548 = dma.done.wait (%p817_p6), %s158_s8, 128  }
  0x53   : > { %550 = vsyncadd (%p817_p6), %s158_s8, 4294967168  ;;  %s375_s3 = sshll.u32 %s734_s5, 2  ;;  %s167_s26 = scalar_lea.sflag [#allocation6], %s734_s5 }
  0x54   : > { %s170_s7 = scalar_lea.vmem [#allocation5], %s375_s3 }
  0x55   : > { %552 = dma.done.wait (%p817_p6), %s167_s26, 64  }
  0x56   : > { %554 = vsyncadd (%p817_p6), %s167_s26, 4294967232  ;;  %vm199_vm0 = vcmask 195584   ;;  %v196_v0 = vld [vmem:[%s161_s30] sm:$0xff]  ;;  %v197_v13 = vld [vmem:[%s170_s7] sm:$0xf]  ;;  %v240_v26 = vlaneseq  ;;  %s377_s20 = sshll.u32 %s614_s13, 3 }
  0x57   : > { %v200_v1 = vsel %vm199_vm0, %v196_v0, -inf  ;;  %v217_v7 = vand.u32 2147483647, %v196_v0  ;;  %v198_v15 = vunpack.c.l.bf16 %v197_v13  ;;  %v214_v21 = vmax.f32 %v196_v0, 0.0  ;;  %s195_s14 = scalar_lea.vmem [#allocation7], %s374_s6  ;;  %s379_s4 = sshll.u32 %s614_s13, 7 }
  0x58   : > { %201 = vmax.xlane.f32.xlu0 %v200_v1  ;;  %v241_v32 = vshrl.u32 %v240_v26, 7  ;;  %v243_v36 = vstv %s377_s20  ;;  %s273_s28 = sshll.u32 %s195_s14, 4  ;;  %s762_s24 = scalar_lea.hbm %s805_s2, %s379_s4  ;;  %s757_s28 = int_to_ptr.vmem [resolvable:$true] %s273_s28 }
  0x59   : > { %v218_v8 = vsub.f32 0.0, %v217_v7  ;;  %v215_v22 = vmul.f32 %v198_v15, %v196_v0  ;;  %v235_v29 = vmul.f32 0.5, %v198_v15  ;;  %s260_s23 = scalar_lea.sflag [#allocation4], %s734_s5  ;;  %s503_s25 = scalar_lea.vmem %s757_s28, 128 }
  0x5a   : > { %v244_v39 = vadd.s32 %v243_v36, %v241_v32  ;;  %p504_p12 = scmp.ne.s32.totalorder %s757_s28, %s503_s25  ;;  %p818_p2 = scmp.ne.s32.totalorder %s810_s21, 0 }
  0x5b   : > { %v219_v9 = vmul.f32 1.442695, %v218_v8  ;;  %v216_v28 = vsub.f32 %v214_v21, %v215_v22  ;;  %v236_v35 = vadd.f32 0.25, %v235_v29  ;;  %s577_s13 = smov [#allocation7]  }
  0x5c   : > { %vm245_vm2 = vcmp.lt.s32.totalorder %v244_v39, 20  ;;  %p505_p4 = pnand %p504_p12, %p818_p2  ;;  %s507_s27 = sshll.u32 %s577_s13, 4  ;;  %s508_s27 = int_to_ptr.vmem [resolvable:$false] %s507_s27 }
  0x5d   : > { %s509_s29 = scalar_lea.vmem %s508_s27, 256  ;;  %p510_p7 = scmp.lt.s32.totalorder %s757_s28, %s508_s27 }
  0x5e   : > { %p506_p5 = pneg %p505_p4  ;;  %p511_p8 = scmp.lt.s32.totalorder %s509_s29, %s503_s25 }
  0x60   : > { %p512_p13 = por %p511_p8, %p510_p7 }
  0x62   : > { %p513_p0 = pnand %p512_p13, %p506_p5 }
  0xe5   : > { %v202_v2 = vpop.xlane.xlu0 %201 }
  0xe6   : > { %v203_v3 = vsub.f32 %v196_v0, %v202_v2 }
  0xe8   : > { %v204_v4 = vmul.f32 1.442695, %v203_v3 }
  0xea   : > { %435 = vpow2.f32 %v204_v4 }
  0xeb   : > { %437 = vpow2.f32 %v219_v9 }
  0xf4   : > { %v436_v5 = vpop.eup %435 }
  0xf5   : > { %v206_v6 = vsel %vm199_vm0, %v436_v5, 0.0  ;;  %v438_v10 = vpop.eup %437 }
  0xf6   : > { %207 = vadd.xlane.f32.xlu0 %v206_v6  ;;  %v221_v11 = vadd.f32 1.0, %v438_v10  ;;  %v224_v14 = vmul.f32 -0.5, %v438_v10  ;;  %v227_v18 = vand.u32 2147483647, %v438_v10 }
  0xf8   : > { %439 = vlog2.f32 %v221_v11  ;;  %v225_v16 = vadd.f32 1.0, %v224_v14  ;;  %vm228_vm1 = vcmp.lt.f32.partialorder %v227_v18, 0.0004427343 }
  0xfa   : > { %v226_v24 = vmul.f32 %v438_v10, %v225_v16 }
 0x102   : > { %v440_v17 = vpop.eup %439 }
 0x103   : > { %v223_v23 = vmul.f32 0.6931472, %v440_v17 }
 0x105   : > { %v229_v30 = vsel %vm228_vm1, %v226_v24, %v223_v23 }
 0x106   : > { %v230_v34 = vadd.f32 %v229_v30, %v216_v28 }
 0x108   : > { %v237_v41 = vmul.f32 %v236_v35, %v230_v34 }
 0x183   : > { %v208_v12 = vpop.xlane.xlu0 %207 }
 0x184   : > { %441 = vrcp.f32 %v208_v12 }
 0x18e   : > { %v442_v19 = vpop.eup %441 }
 0x18f   : > { %v210_v20 = vmul.f32 %v442_v19, %v208_v12 }
 0x191   : > { %v211_v25 = vsub.f32 2.0, %v210_v20 }
 0x193   : > { %v212_v27 = vmul.f32 %v442_v19, %v211_v25 }
 0x195   : > { %v213_v31 = vmul.f32 %v436_v5, %v212_v27 }
 0x197   : > { %v232_v33 = vmul.f32 2.0, %v213_v31  ;;  %v231_v37 = vadd.f32 %v213_v31, %v198_v15 }
 0x199   : > { %v233_v38 = vmul.f32 %v232_v33, %v198_v15 }
 0x19b   : > { %v234_v40 = vsub.f32 %v231_v37, %v233_v38 }
 0x19d   : > { %v238_v42 = vmul.f32 %v234_v40, %v234_v40 }
 0x19f   : > { %v239_v43 = vmul.f32 %v238_v42, %v237_v41 }
 0x1a1   : > { %v246_v44 = vsel %vm245_vm2, %v239_v43, 0.0 }
 0x1a2   : > { %v247_v45 = vsel %vm199_vm0, %v246_v44, 0.0 }
 0x1a3   : > { %248 = vadd.xlane.f32.xlu1 %v247_v45 }
 0x230   : > { %v249_v46 = vpop.xlane.xlu1 %248 }
 0x231   : > { %v250_v47 = vrot.slane %v249_v46, 4 }
 0x233   : > { %v251_v48 = vadd.f32 %v250_v47, %v249_v46 }
 0x235   : > { %v252_v49 = vrot.slane %v251_v48, 2 }
 0x237   : > { %v253_v50 = vadd.f32 %v252_v49, %v251_v48 }
 0x239   : > { %v254_v51 = vrot.slane %v253_v50, 1 }
 0x23b   : > { %v255_v52 = vadd.f32 %v254_v51, %v253_v50 }
 0x23d   : > { %382 = vpush %v255_v52 }
 0x26e   : > { %s383_s16 = spop %382 }
 0x26f   : > { %v257_v53 = vstv %s383_s16 }
 0x270   : > { %258 = vst [vmem:[%s195_s14] sm:$0xff] %v257_v53 }
 0x271   : > { %516 = shalt.err (!%p513_p0)
}
 0x272   : > { %s517_s5 = scalar_lea.hbm %s762_s24, 128  ;;  %s521_s30 = scalar_lea.hbm %s805_s2, 384 }
 0x273   : > { %p518_p10 = scmp.ne.s32.totalorder %s762_s24, %s517_s5  ;;  %p522_p3 = scmp.lt.u32.totalorder %s762_s24, %s805_s2 }
 0x274   : > { %p523_p9 = scmp.lt.u32.totalorder %s521_s30, %s517_s5  ;;  %p525_p12 = scmp.lt.u32.totalorder %s517_s5, %s762_s24 }
 0x275   : > { %p519_p11 = pnand %p518_p10, %p818_p2 }
 0x276   : > { %p524_p6 = por %p523_p9, %p522_p3 }
 0x277   : > { %p520_p1 = pneg %p519_p11 }
 0x278   : > { %p526_p4 = por %p525_p12, %p524_p6 }
 0x27a   : > { %p527_p5 = pnand %p526_p4, %p520_p1 }
 0x27c   : > { %530 = shalt.err (!%p527_p5)
}
 0x27d   : > { %388 = dma.vmem_to_hbm [thread:$0]  (%p818_p2), %s757_s28, 128, %s762_s24, %s260_s23  }
 0x27e PF: > { %p402_p7 = scmp.ge.s32.totalorder %s573_s12, 2  ;;  %s285_s7 = sand.u32 1, %s561_s9  }
 0x27f   : > { %p819_p8 = scmp.ne.s32.totalorder %s811_s22, 0  ;;  %s286_s20 = scalar_lea.sflag [#allocation4], %s285_s7 }
 0x281   : > { %p398_p13 = pnand %p402_p7, %p819_p8 }
 0x283   : > { %556 = dma.done.wait (!%p398_p13), %s286_s20, 128  }
 0x284   : > { %558 = vsyncadd (!%p398_p13), %s286_s20, 4294967168  ;;  %p18_p0 = scmp.ge.s32.totalorder %s618_s15, 5   ;;  %s820_s9 = smov %s565_s10 }
 0x285   : > { %s821_s10 = smov %s569_s11  ;;  %s822_s11 = smov %s630_s18 }
 0x286   : > { %s823_s12 = smov %s618_s15  ;;  %20 = sbr.rel (!%p18_p0) target bundleno = 7 (0x7), region = 86 }
 0x28d   :  { %291 = vsyncpa [#allocation3], 1 }
 0x28e   :  { %293 = vsyncpa [#allocation3 + $0x1], 1 }
 0x28f   :  { %294 = vsyncpa [#allocation6], 1 }
 0x290   :  { %296 = vsyncpa [#allocation6 + $0x1], 1 }
 0x291   :  { %297 = vsyncpa [#allocation4], 1 }
 0x292   :  { %299 = vsyncpa [#allocation4 + $0x1], 1 }

</bundles_post_ra>
